<compile_context>
chip_gen: v7x
topology: tpu7x:2x2x1
jax: 0.10.0
libtpu: 0.0.40
codegen_flags: <defaults>
</compile_context>

<pallas_src>
import functools
import math

import jax
import jax.numpy as jnp
from jax.experimental import pallas as pl
from jax.experimental.pallas import tpu as pltpu


# ----------------------------------------------------------------------------
# Kernel 1: tiled dense linear layer  y = x @ W^T + b
#   x: (M, K) bf16, W: (N, K) bf16 (PyTorch layout, never transposed on host),
#   b: (1, N) f32.  bf16 MXU operands, f32 accumulation in VMEM scratch.
# ----------------------------------------------------------------------------
def _linear_kernel(x_ref, w_ref, b_ref, o_ref, acc_ref):
    @pl.when(pl.program_id(2) == 0)
    def _():
        acc_ref[...] = jnp.zeros_like(acc_ref)

    # Contract K on both operands: (tm, tk) x (tn, tk) -> (tm, tn).
    acc_ref[...] += jax.lax.dot_general(
        x_ref[...], w_ref[...], (((1,), (1,)), ((), ())),
        preferred_element_type=jnp.float32)

    @pl.when(pl.program_id(2) == pl.num_programs(2) - 1)
    def _():
        o_ref[...] = (acc_ref[...] + b_ref[...]).astype(o_ref.dtype)


def _round_up(x, m):
    return ((x + m - 1) // m) * m


def _pick_tile(dim, target, align):
    """Largest tile <= target that is a multiple of `align` and divides `dim`,
    else the full dimension (always a legal block size)."""
    if dim <= target:
        return dim
    t = (min(target, dim) // align) * align
    while t >= align:
        if dim % t == 0:
            return t
        t -= align
    return dim


def pallas_linear(x2d, w, b, *, out_dtype=jnp.float32,
                  tm_target=512, tn_target=512, tk_target=1024, full_n=False):
    """x2d: (M, Din) bf16;  w: (Dout, Din) bf16 (PyTorch layout);  b: (Dout,) f32."""
    m, k_dim = x2d.shape
    n = w.shape[0]
    out_isz = jnp.dtype(out_dtype).itemsize

    # M tiling: 16-aligned (bf16 sublane packing); pad M to a tile multiple and
    # slice the padded rows off after the call (no silent full-M fallback).
    tm = min(tm_target, _round_up(m, 16))
    m_pad = _round_up(m, tm)
    if m_pad != m:
        x2d = jnp.pad(x2d, ((0, m_pad - m), (0, 0)))

    tk = _pick_tile(k_dim, tk_target, 128)
    if full_n:
        tn = n
        # Guard: full-N weight tile (double-buffered) + f32 accumulator + out tile
        # must stay well inside v7x's 64 MiB VMEM; otherwise fall back to tiling.
        if 2 * n * tk * 2 + tm * n * 4 + 2 * tm * n * out_isz > (36 << 20):
            tn = _pick_tile(n, tn_target, 128)
    else:
        tn = _pick_tile(n, tn_target, 128)

    grid = (m_pad // tm, n // tn, k_dim // tk)

    needed = (2 * (tm * tk * 2 + tn * tk * 2 + tn * 4)   # double-buffered inputs
              + 2 * tm * tn * out_isz                    # double-buffered output
              + tm * tn * 4)                             # f32 accumulator
    vmem_limit = int(min(max(needed * 4 // 3, 32 << 20), 56 << 20))

    out = pl.pallas_call(
        _linear_kernel,
        out_shape=jax.ShapeDtypeStruct((m_pad, n), out_dtype),
        grid_spec=pltpu.PrefetchScalarGridSpec(
            num_scalar_prefetch=0,
            grid=grid,
            in_specs=[
                pl.BlockSpec((tm, tk), lambda i, j, k: (i, k)),
                pl.BlockSpec((tn, tk), lambda i, j, k: (j, k)),
                pl.BlockSpec((1, tn), lambda i, j, k: (0, j)),
            ],
            out_specs=pl.BlockSpec((tm, tn), lambda i, j, k: (i, j)),
            scratch_shapes=[pltpu.VMEM((tm, tn), jnp.float32)],
        ),
        compiler_params=pltpu.CompilerParams(
            dimension_semantics=("parallel", "parallel", "arbitrary"),
            vmem_limit_bytes=vmem_limit),
    )(x2d, w, b.astype(jnp.float32).reshape(1, n))
    return out[:m] if m_pad != m else out


# ----------------------------------------------------------------------------
# Kernel 2: RoPE + scaled-dot-product attention.
#   One batch element (all heads) per grid step.
#   qkv block: (S, 3*D) bf16;  cos/sin blocks: (1, Dh) f32 (q-side pre-scaled by
#   1/sqrt(Dh), sin sign-folded);  out block: (S, D) lane-dense bf16.
# ----------------------------------------------------------------------------
def _rope_attn_kernel(qkv_ref, cq_ref, sq_ref, ck_ref, sk_ref, o_ref,
                      *, nhead, head_dim, d_model):
    d2 = head_dim // 2
    cq = cq_ref[...]     # (1, Dh), cos * 1/sqrt(Dh)
    sq = sq_ref[...]     # (1, Dh), sin * sign * 1/sqrt(Dh)
    ck = ck_ref[...]     # (1, Dh), cos
    sk = sk_ref[...]     # (1, Dh), sin * sign

    def rope(t, c, s_):  # t: (S, Dh) f32; roll runs on the otherwise-idle XLU
        return t * c + pltpu.roll(t, shift=d2, axis=1) * s_

    # TODO(synk): for Dh not a multiple of 128, per-head column slices are not
    # lane-aligned; a (3, H, S, Dh) layout would make every head lane-dense.
    for h in range(nhead):  # static unroll
        lo = h * head_dim
        # elementwise RoPE math in f32 (v5e VPU has no bf16); bf16 only at the MXU
        q = rope(qkv_ref[:, lo:lo + head_dim].astype(jnp.float32), cq, sq)
        k = rope(qkv_ref[:, d_model + lo:d_model + lo + head_dim]
                 .astype(jnp.float32), ck, sk)
        v = qkv_ref[:, 2 * d_model + lo:2 * d_model + lo + head_dim]  # bf16

        # scores: contract the last axis of q and k directly (no explicit k.T);
        # the 1/sqrt(Dh) scale is already folded into cq/sq.
        s = jax.lax.dot_general(
            q.astype(jnp.bfloat16), k.astype(jnp.bfloat16),
            (((1,), (1,)), ((), ())),
            preferred_element_type=jnp.float32)
        s = s - jnp.max(s, axis=-1, keepdims=True)
        p = jnp.exp(s)
        p = p * pl.reciprocal(jnp.sum(p, axis=-1, keepdims=True), approx=True)

        # direct per-head store into the lane-dense (S, D) output slab
        o_ref[:, lo:lo + head_dim] = jnp.dot(
            p.astype(jnp.bfloat16), v,
            preferred_element_type=jnp.float32).astype(o_ref.dtype)


def pallas_rope_attention(qkv, cos_q, sin_q, cos_k, sin_k, *, nhead):
    """qkv: (B, S, 3*D) bf16;  cos/sin: (B, 1, Dh) f32 (batch-indexed RoPE)."""
    b, s, d3 = qkv.shape
    d = d3 // 3
    dh = d // nhead
    kernel = functools.partial(
        _rope_attn_kernel, nhead=nhead, head_dim=dh, d_model=d)

    needed = (2 * s * d3 * 2 + 2 * s * d * 2        # double-buffered qkv / out
              + 4 * 2 * dh * 4                       # cos/sin
              + s * s * 4 + 2 * s * dh * 4)          # per-head scores + q/k f32
    vmem_limit = int(min(max(needed * 2, 32 << 20), 56 << 20))

    return pl.pallas_call(
        kernel,
        out_shape=jax.ShapeDtypeStruct((b, s, d), jnp.bfloat16),
        grid=(b,),
        in_specs=[
            pl.BlockSpec((None, s, d3), lambda bi: (bi, 0, 0)),
            pl.BlockSpec((None, 1, dh), lambda bi: (bi, 0, 0)),
            pl.BlockSpec((None, 1, dh), lambda bi: (bi, 0, 0)),
            pl.BlockSpec((None, 1, dh), lambda bi: (bi, 0, 0)),
            pl.BlockSpec((None, 1, dh), lambda bi: (bi, 0, 0)),
        ],
        out_specs=pl.BlockSpec((None, s, d), lambda bi: (bi, 0, 0)),
        compiler_params=pltpu.CompilerParams(
            dimension_semantics=("parallel",),
            vmem_limit_bytes=vmem_limit),
    )(qkv, cos_q, sin_q, cos_k, sin_k)


# ----------------------------------------------------------------------------
# Glue: RoPE cache, one-time parameter prep, full forward pass
# ----------------------------------------------------------------------------
def build_rope_cache(n_pos, d, base=10000):
    theta = 1.0 / (base ** (jnp.arange(0, d, 2, dtype=jnp.float32) / d))
    idx = jnp.arange(n_pos, dtype=jnp.float32)
    idx_theta = jnp.einsum("n,d->nd", idx, theta)
    idx_theta2 = jnp.concatenate([idx_theta, idx_theta], axis=1)   # (n_pos, d)
    return jnp.cos(idx_theta2), jnp.sin(idx_theta2)


def prepare_params(params):
    """One-time prep: fuse QKV weights and cast all weights to bf16 (MXU operands)."""
    w_qkv = jnp.concatenate([params["wq"], params["wk"], params["wv"]], axis=0)
    b_qkv = jnp.concatenate([params["bq"], params["bk"], params["bv"]], axis=0)
    return dict(
        w_qkv=w_qkv.astype(jnp.bfloat16),
        b_qkv=b_qkv.astype(jnp.float32),
        wo=params["wo"].astype(jnp.bfloat16),
        bo=params["bo"].astype(jnp.float32),
    )


def rope_mha_forward(x, prep, nhead):
    b, s, d = x.shape
    dh = d // nhead
    d2 = dh // 2
    xf = x.reshape(b * s, d).astype(jnp.bfloat16)   # cast once in the wrapper

    # Fused QKV projection; full-N output tile so x is streamed from HBM once.
    qkv = pallas_linear(xf, prep["w_qkv"], prep["b_qkv"],
                        out_dtype=jnp.bfloat16, full_n=True)     # (B*S, 3*D) bf16
    qkv = qkv.reshape(b, s, 3 * d)                               # free reshape

    # Reference code indexes RoPE positions by q.shape[0] == batch (see notes).
    cos, sin = build_rope_cache(b, dh)                           # (B, Dh)
    sign = jnp.concatenate([-jnp.ones((d2,), jnp.float32),
                            jnp.ones((d2,), jnp.float32)])
    sin_signed = sin * sign[None, :]
    scale = 1.0 / math.sqrt(dh)
    cos_q = (cos * scale).reshape(b, 1, dh)          # fold 1/sqrt(Dh) into q side
    sin_q = (sin_signed * scale).reshape(b, 1, dh)
    cos_k = cos.reshape(b, 1, dh)
    sin_k = sin_signed.reshape(b, 1, dh)

    attn = pallas_rope_attention(qkv, cos_q, sin_q, cos_k, sin_k,
                                 nhead=nhead)                    # (B, S, D) bf16

    out = pallas_linear(attn.reshape(b * s, d), prep["wo"], prep["bo"],
                        out_dtype=jnp.float32)
    return out.reshape(b, s, d)


# ----------------------------------------------------------------------------
# Pure-JAX reference (same math, full f32) for a sanity check.
# ----------------------------------------------------------------------------
def reference_forward(x, params, nhead):
    hi = jax.lax.Precision.HIGHEST
    b, s, d = x.shape
    dh = d // nhead

    def lin(t, w, bb):
        return jnp.einsum("nd,od->no", t, w, precision=hi) + bb

    xf = x.reshape(b * s, d)
    q = lin(xf, params["wq"], params["bq"]).reshape(b, s, nhead, dh).transpose(0, 2, 1, 3)
    k = lin(xf, params["wk"], params["bk"]).reshape(b, s, nhead, dh).transpose(0, 2, 1, 3)
    v = lin(xf, params["wv"], params["bv"]).reshape(b, s, nhead, dh).transpose(0, 2, 1, 3)

    cos, sin = build_rope_cache(b, dh)
    cos = cos[:, None, None, :]
    sin = sin[:, None, None, :]

    def rope(t):
        d2 = dh // 2
        neg_half = jnp.concatenate([-t[..., d2:], t[..., :d2]], axis=-1)
        return t * cos + neg_half * sin

    q, k = rope(q), rope(k)
    a = jnp.einsum("bhqd,bhkd->bhqk", q, k, precision=hi) / math.sqrt(dh)
    a = jax.nn.softmax(a, axis=-1)
    o = jnp.einsum("bhqk,bhkd->bhqd", a, v, precision=hi)
    o = o.transpose(0, 2, 1, 3).reshape(b * s, d)
    return lin(o, params["wo"], params["bo"]).reshape(b, s, d)


if __name__ == "__main__":
    batch, seq, d_model, nhead = 2, 8, 32, 4

    key = jax.random.PRNGKey(0)
    ks = jax.random.split(key, 9)
    x = jax.random.normal(ks[0], (batch, seq, d_model), dtype=jnp.float32)

    def init_linear(kw, kb):
        bound = 1.0 / math.sqrt(d_model)
        w = jax.random.uniform(kw, (d_model, d_model), jnp.float32, -bound, bound)
        bb = jax.random.uniform(kb, (d_model,), jnp.float32, -bound, bound)
        return w, bb

    wq, bq = init_linear(ks[1], ks[2])
    wk, bk = init_linear(ks[3], ks[4])
    wv, bv = init_linear(ks[5], ks[6])
    wo, bo = init_linear(ks[7], ks[8])
    params = dict(wq=wq, bq=bq, wk=wk, bk=bk, wv=wv, bv=bv, wo=wo, bo=bo)
    prep = prepare_params(params)   # weights cast to bf16 once, not per forward

    fwd = jax.jit(functools.partial(rope_mha_forward, nhead=nhead))
    out = jax.block_until_ready(fwd(x, prep))

    ref = jax.block_until_ready(reference_forward(x, params, nhead))
    assert out.shape == (batch, seq, d_model)
    assert bool(jnp.all(jnp.isfinite(out)))
    # bf16 MXU operands + bf16 intermediates (QKV / attention outputs) + approx
    # reciprocal => slightly looser tolerance vs. the full-f32 reference.
    assert bool(jnp.allclose(out, ref, atol=5e-2, rtol=5e-2)), "mismatch vs reference"

    print("KERNEL_OK")
</pallas_src>

<mosaic_0001>
module attributes {stable_mosaic.version = 11 : i64} {
  func.func @_linear_kernel(%arg0: i32, %arg1: i32, %arg2: i32, %arg3: memref<16x32xbf16, #tpu.memory_space<vmem>>, %arg4: memref<96x32xbf16, #tpu.memory_space<vmem>>, %arg5: memref<1x96xf32, #tpu.memory_space<vmem>>, %arg6: memref<16x96xbf16, #tpu.memory_space<vmem>>, %arg7: memref<16x96xf32, #tpu.memory_space<vmem>>) attributes {dimension_semantics = [#tpu.dimension_semantics<parallel>, #tpu.dimension_semantics<parallel>, #tpu.dimension_semantics<arbitrary>], iteration_bounds = array<i64: 1, 1, 1>, scalar_prefetch = 0 : i64, scratch_operands = 1 : i64, tpu.core_type = #tpu.core_type<tc>, window_params = [{transform_indices = @transform_0, window_bounds = array<i64: 16, 32>}, {transform_indices = @transform_1, window_bounds = array<i64: 96, 32>}, {transform_indices = @transform_2, window_bounds = array<i64: 1, 96>}, {transform_indices = @transform_3, window_bounds = array<i64: 16, 96>}]} {
    %c0_i32 = arith.constant 0 : i32
    %0 = arith.cmpi eq, %arg2, %c0_i32 : i32
    %1 = arith.extui %0 : i1 to i32
    %c0_i32_0 = arith.constant 0 : i32
    %2 = arith.cmpi ne, %1, %c0_i32_0 : i32
    scf.if %2 {
      %cst_10 = arith.constant 0.000000e+00 : f32
      %12 = vector.broadcast %cst_10 : f32 to vector<16x96xf32>
      %c0_11 = arith.constant 0 : index
      %c0_12 = arith.constant 0 : index
      %13 = vector.load %arg7[%c0_11, %c0_12] : memref<16x96xf32, #tpu.memory_space<vmem>>, vector<16x96xf32>
      tpu.vector_store %arg7[%c0_11, %c0_12], %12 {strides = array<i32>} : memref<16x96xf32, #tpu.memory_space<vmem>>, vector<16x96xf32>,
    } else {
    }
    %c0 = arith.constant 0 : index
    %c0_1 = arith.constant 0 : index
    %3 = vector.load %arg7[%c0, %c0_1] : memref<16x96xf32, #tpu.memory_space<vmem>>, vector<16x96xf32>
    %c0_2 = arith.constant 0 : index
    %c0_3 = arith.constant 0 : index
    %4 = vector.load %arg3[%c0_2, %c0_3] : memref<16x32xbf16, #tpu.memory_space<vmem>>, vector<16x32xbf16>
    %c0_4 = arith.constant 0 : index
    %c0_5 = arith.constant 0 : index
    %5 = vector.load %arg4[%c0_4, %c0_5] : memref<96x32xbf16, #tpu.memory_space<vmem>>, vector<96x32xbf16>
    %cst = arith.constant dense<0.000000e+00> : vector<16x96xf32>
    %6 = tpu.matmul %4, %5, %cst {dimension_numbers = #tpu.dot_dimension_numbers<[1], [1], [0], [0], [0, 0, 1, 0], [], []>} : vector<16x32xbf16>, vector<96x32xbf16>, vector<16x96xf32> -> vector<16x96xf32>
    %7 = arith.addf %3, %6 : vector<16x96xf32>
    %c0_6 = arith.constant 0 : index
    %c0_7 = arith.constant 0 : index
    %8 = vector.load %arg7[%c0_6, %c0_7] : memref<16x96xf32, #tpu.memory_space<vmem>>, vector<16x96xf32>
    tpu.vector_store %arg7[%c0_6, %c0_7], %7 {strides = array<i32>} : memref<16x96xf32, #tpu.memory_space<vmem>>, vector<16x96xf32>,
    %c0_i32_8 = arith.constant 0 : i32
    %9 = arith.cmpi eq, %arg2, %c0_i32_8 : i32
    %10 = arith.extui %9 : i1 to i32
    %c0_i32_9 = arith.constant 0 : i32
    %11 = arith.cmpi ne, %10, %c0_i32_9 : i32
    scf.if %11 {
      %c0_10 = arith.constant 0 : index
      %c0_11 = arith.constant 0 : index
      %12 = vector.load %arg7[%c0_10, %c0_11] : memref<16x96xf32, #tpu.memory_space<vmem>>, vector<16x96xf32>
      %c0_12 = arith.constant 0 : index
      %c0_13 = arith.constant 0 : index
      %13 = vector.load %arg5[%c0_12, %c0_13] : memref<1x96xf32, #tpu.memory_space<vmem>>, vector<1x96xf32>
      %14 = vector.broadcast %13 : vector<1x96xf32> to vector<16x96xf32>
      %15 = arith.addf %12, %14 : vector<16x96xf32>
      %16 = arith.truncf %15 : vector<16x96xf32> to vector<16x96xbf16>
      %c0_14 = arith.constant 0 : index
      %c0_15 = arith.constant 0 : index
      %17 = vector.load %arg6[%c0_14, %c0_15] : memref<16x96xbf16, #tpu.memory_space<vmem>>, vector<16x96xbf16>
      tpu.vector_store %arg6[%c0_14, %c0_15], %16 {strides = array<i32>} : memref<16x96xbf16, #tpu.memory_space<vmem>>, vector<16x96xbf16>,
    } else {
    }
    return
  }
  func.func @transform_0(%arg0: i32, %arg1: i32, %arg2: i32) -> (i32, i32) {
    %c0_i32 = arith.constant 0 : i32
    return %arg0, %arg2 : i32, i32
  }
  func.func @transform_1(%arg0: i32, %arg1: i32, %arg2: i32) -> (i32, i32) {
    %c0_i32 = arith.constant 0 : i32
    return %arg1, %arg2 : i32, i32
  }
  func.func @transform_2(%arg0: i32, %arg1: i32, %arg2: i32) -> (i32, i32) {
    %c0_i32 = arith.constant 0 : i32
    %c0_i32_0 = arith.constant 0 : i32
    return %c0_i32, %arg1 : i32, i32
  }
  func.func @transform_3(%arg0: i32, %arg1: i32, %arg2: i32) -> (i32, i32) {
    %c0_i32 = arith.constant 0 : i32
    return %arg0, %arg1 : i32, i32
  }
}

module attributes {stable_mosaic.version = 11 : i64} {
  func.func @_linear_kernel(%arg0: i32, %arg1: i32, %arg2: i32, %arg3: memref<16x32xbf16, #tpu.memory_space<vmem>>, %arg4: memref<32x32xbf16, #tpu.memory_space<vmem>>, %arg5: memref<1x32xf32, #tpu.memory_space<vmem>>, %arg6: memref<16x32xf32, #tpu.memory_space<vmem>>, %arg7: memref<16x32xf32, #tpu.memory_space<vmem>>) attributes {dimension_semantics = [#tpu.dimension_semantics<parallel>, #tpu.dimension_semantics<parallel>, #tpu.dimension_semantics<arbitrary>], iteration_bounds = array<i64: 1, 1, 1>, scalar_prefetch = 0 : i64, scratch_operands = 1 : i64, tpu.core_type = #tpu.core_type<tc>, window_params = [{transform_indices = @transform_0, window_bounds = array<i64: 16, 32>}, {transform_indices = @transform_1, window_bounds = array<i64: 32, 32>}, {transform_indices = @transform_2, window_bounds = array<i64: 1, 32>}, {transform_indices = @transform_3, window_bounds = array<i64: 16, 32>}]} {
    %c0_i32 = arith.constant 0 : i32
    %0 = arith.cmpi eq, %arg2, %c0_i32 : i32
    %1 = arith.extui %0 : i1 to i32
    %c0_i32_0 = arith.constant 0 : i32
    %2 = arith.cmpi ne, %1, %c0_i32_0 : i32
    scf.if %2 {
      %cst_10 = arith.constant 0.000000e+00 : f32
      %12 = vector.broadcast %cst_10 : f32 to vector<16x32xf32>
      %c0_11 = arith.constant 0 : index
      %c0_12 = arith.constant 0 : index
      %13 = vector.load %arg7[%c0_11, %c0_12] : memref<16x32xf32, #tpu.memory_space<vmem>>, vector<16x32xf32>
      tpu.vector_store %arg7[%c0_11, %c0_12], %12 {strides = array<i32>} : memref<16x32xf32, #tpu.memory_space<vmem>>, vector<16x32xf32>,
    } else {
    }
    %c0 = arith.constant 0 : index
    %c0_1 = arith.constant 0 : index
    %3 = vector.load %arg7[%c0, %c0_1] : memref<16x32xf32, #tpu.memory_space<vmem>>, vector<16x32xf32>
    %c0_2 = arith.constant 0 : index
    %c0_3 = arith.constant 0 : index
    %4 = vector.load %arg3[%c0_2, %c0_3] : memref<16x32xbf16, #tpu.memory_space<vmem>>, vector<16x32xbf16>
    %c0_4 = arith.constant 0 : index
    %c0_5 = arith.constant 0 : index
    %5 = vector.load %arg4[%c0_4, %c0_5] : memref<32x32xbf16, #tpu.memory_space<vmem>>, vector<32x32xbf16>
    %cst = arith.constant dense<0.000000e+00> : vector<16x32xf32>
    %6 = tpu.matmul %4, %5, %cst {dimension_numbers = #tpu.dot_dimension_numbers<[1], [1], [0], [0], [0, 0, 1, 0], [], []>} : vector<16x32xbf16>, vector<32x32xbf16>, vector<16x32xf32> -> vector<16x32xf32>
    %7 = arith.addf %3, %6 : vector<16x32xf32>
    %c0_6 = arith.constant 0 : index
    %c0_7 = arith.constant 0 : index
    %8 = vector.load %arg7[%c0_6, %c0_7] : memref<16x32xf32, #tpu.memory_space<vmem>>, vector<16x32xf32>
    tpu.vector_store %arg7[%c0_6, %c0_7], %7 {strides = array<i32>} : memref<16x32xf32, #tpu.memory_space<vmem>>, vector<16x32xf32>,
    %c0_i32_8 = arith.constant 0 : i32
    %9 = arith.cmpi eq, %arg2, %c0_i32_8 : i32
    %10 = arith.extui %9 : i1 to i32
    %c0_i32_9 = arith.constant 0 : i32
    %11 = arith.cmpi ne, %10, %c0_i32_9 : i32
    scf.if %11 {
      %c0_10 = arith.constant 0 : index
      %c0_11 = arith.constant 0 : index
      %12 = vector.load %arg7[%c0_10, %c0_11] : memref<16x32xf32, #tpu.memory_space<vmem>>, vector<16x32xf32>
      %c0_12 = arith.constant 0 : index
      %c0_13 = arith.constant 0 : index
      %13 = vector.load %arg5[%c0_12, %c0_13] : memref<1x32xf32, #tpu.memory_space<vmem>>, vector<1x32xf32>
      %14 = vector.broadcast %13 : vector<1x32xf32> to vector<16x32xf32>
      %15 = arith.addf %12, %14 : vector<16x32xf32>
      %c0_14 = arith.constant 0 : index
      %c0_15 = arith.constant 0 : index
      %16 = vector.load %arg6[%c0_14, %c0_15] : memref<16x32xf32, #tpu.memory_space<vmem>>, vector<16x32xf32>
      tpu.vector_store %arg6[%c0_14, %c0_15], %15 {strides = array<i32>} : memref<16x32xf32, #tpu.memory_space<vmem>>, vector<16x32xf32>,
    } else {
    }
    return
  }
  func.func @transform_0(%arg0: i32, %arg1: i32, %arg2: i32) -> (i32, i32) {
    %c0_i32 = arith.constant 0 : i32
    return %arg0, %arg2 : i32, i32
  }
  func.func @transform_1(%arg0: i32, %arg1: i32, %arg2: i32) -> (i32, i32) {
    %c0_i32 = arith.constant 0 : i32
    return %arg1, %arg2 : i32, i32
  }
  func.func @transform_2(%arg0: i32, %arg1: i32, %arg2: i32) -> (i32, i32) {
    %c0_i32 = arith.constant 0 : i32
    %c0_i32_0 = arith.constant 0 : i32
    return %c0_i32, %arg1 : i32, i32
  }
  func.func @transform_3(%arg0: i32, %arg1: i32, %arg2: i32) -> (i32, i32) {
    %c0_i32 = arith.constant 0 : i32
    return %arg0, %arg1 : i32, i32
  }
}

module attributes {stable_mosaic.version = 11 : i64} {
  func.func @_rope_attn_kernel(%arg0: i32, %arg1: memref<1x8x96xbf16, #tpu.memory_space<vmem>>, %arg2: memref<1x1x8xf32, #tpu.memory_space<vmem>>, %arg3: memref<1x1x8xf32, #tpu.memory_space<vmem>>, %arg4: memref<1x1x8xf32, #tpu.memory_space<vmem>>, %arg5: memref<1x1x8xf32, #tpu.memory_space<vmem>>, %arg6: memref<1x8x32xbf16, #tpu.memory_space<vmem>>) attributes {dimension_semantics = [#tpu.dimension_semantics<parallel>], iteration_bounds = array<i64: 2>, scalar_prefetch = 0 : i64, scratch_operands = 0 : i64, tpu.core_type = #tpu.core_type<tc>, window_params = [{transform_indices = @transform_0, window_bounds = array<i64: 1, 8, 96>}, {transform_indices = @transform_1, window_bounds = array<i64: 1, 1, 8>}, {transform_indices = @transform_2, window_bounds = array<i64: 1, 1, 8>}, {transform_indices = @transform_3, window_bounds = array<i64: 1, 1, 8>}, {transform_indices = @transform_4, window_bounds = array<i64: 1, 1, 8>}, {transform_indices = @transform_5, window_bounds = array<i64: 1, 8, 32>}]} {
    %c0 = arith.constant 0 : index
    %c0_0 = arith.constant 0 : index
    %c0_1 = arith.constant 0 : index
    %0 = vector.load %arg2[%c0, %c0_0, %c0_1] : memref<1x1x8xf32, #tpu.memory_space<vmem>>, vector<1x1x8xf32>
    %1 = vector.shape_cast %0 : vector<1x1x8xf32> to vector<1x8xf32>
    %c0_2 = arith.constant 0 : index
    %c0_3 = arith.constant 0 : index
    %c0_4 = arith.constant 0 : index
    %2 = vector.load %arg3[%c0_2, %c0_3, %c0_4] : memref<1x1x8xf32, #tpu.memory_space<vmem>>, vector<1x1x8xf32>
    %3 = vector.shape_cast %2 : vector<1x1x8xf32> to vector<1x8xf32>
    %c0_5 = arith.constant 0 : index
    %c0_6 = arith.constant 0 : index
    %c0_7 = arith.constant 0 : index
    %4 = vector.load %arg4[%c0_5, %c0_6, %c0_7] : memref<1x1x8xf32, #tpu.memory_space<vmem>>, vector<1x1x8xf32>
    %5 = vector.shape_cast %4 : vector<1x1x8xf32> to vector<1x8xf32>
    %c0_8 = arith.constant 0 : index
    %c0_9 = arith.constant 0 : index
    %c0_10 = arith.constant 0 : index
    %6 = vector.load %arg5[%c0_8, %c0_9, %c0_10] : memref<1x1x8xf32, #tpu.memory_space<vmem>>, vector<1x1x8xf32>
    %7 = vector.shape_cast %6 : vector<1x1x8xf32> to vector<1x8xf32>
    %c0_11 = arith.constant 0 : index
    %c0_12 = arith.constant 0 : index
    %c0_13 = arith.constant 0 : index
    %8 = vector.load %arg1[%c0_11, %c0_12, %c0_13] : memref<1x8x96xbf16, #tpu.memory_space<vmem>>, vector<1x8x8xbf16>
    %9 = vector.shape_cast %8 : vector<1x8x8xbf16> to vector<8x8xbf16>
    %10 = arith.extf %9 : vector<8x8xbf16> to vector<8x8xf32>
    %11 = vector.broadcast %1 : vector<1x8xf32> to vector<8x8xf32>
    %12 = arith.mulf %10, %11 : vector<8x8xf32>
    %c4_i32 = arith.constant 4 : i32
    %13 = tpu.dynamic_rotate %10 by %c4_i32 dim 1 : vector<8x8xf32>, i32 -> vector<8x8xf32>
    %14 = vector.broadcast %3 : vector<1x8xf32> to vector<8x8xf32>
    %15 = arith.mulf %13, %14 : vector<8x8xf32>
    %16 = arith.addf %12, %15 : vector<8x8xf32>
    %c0_14 = arith.constant 0 : index
    %c0_15 = arith.constant 0 : index
    %c32 = arith.constant 32 : index
    %17 = vector.load %arg1[%c0_14, %c0_15, %c32] : memref<1x8x96xbf16, #tpu.memory_space<vmem>>, vector<1x8x8xbf16>
    %18 = vector.shape_cast %17 : vector<1x8x8xbf16> to vector<8x8xbf16>
    %19 = arith.extf %18 : vector<8x8xbf16> to vector<8x8xf32>
    %20 = vector.broadcast %5 : vector<1x8xf32> to vector<8x8xf32>
    %21 = arith.mulf %19, %20 : vector<8x8xf32>
    %c4_i32_16 = arith.constant 4 : i32
    %22 = tpu.dynamic_rotate %19 by %c4_i32_16 dim 1 : vector<8x8xf32>, i32 -> vector<8x8xf32>
    %23 = vector.broadcast %7 : vector<1x8xf32> to vector<8x8xf32>
    %24 = arith.mulf %22, %23 : vector<8x8xf32>
    %25 = arith.addf %21, %24 : vector<8x8xf32>
    %c0_17 = arith.constant 0 : index
    %c0_18 = arith.constant 0 : index
    %c64 = arith.constant 64 : index
    %26 = vector.load %arg1[%c0_17, %c0_18, %c64] : memref<1x8x96xbf16, #tpu.memory_space<vmem>>, vector<1x8x8xbf16>
    %27 = vector.shape_cast %26 : vector<1x8x8xbf16> to vector<8x8xbf16>
    %28 = arith.truncf %16 : vector<8x8xf32> to vector<8x8xbf16>
    %29 = arith.truncf %25 : vector<8x8xf32> to vector<8x8xbf16>
    %cst = arith.constant dense<0.000000e+00> : vector<8x8xf32>
    %30 = tpu.matmul %28, %29, %cst {dimension_numbers = #tpu.dot_dimension_numbers<[1], [1], [0], [0], [0, 0, 1, 0], [], []>} : vector<8x8xbf16>, vector<8x8xbf16>, vector<8x8xf32> -> vector<8x8xf32>
    %cst_19 = arith.constant dense<0xFF800000> : vector<8xf32>
    %31 = vector.multi_reduction <maximumf>, %30, %cst_19 [1] : vector<8x8xf32> to vector<8xf32>
    %32 = vector.shape_cast %31 : vector<8xf32> to vector<8x1xf32>
    %33 = vector.broadcast %32 : vector<8x1xf32> to vector<8x8xf32>
    %34 = arith.subf %30, %33 : vector<8x8xf32>
    %35 = math.exp %34 : vector<8x8xf32>
    %cst_20 = arith.constant dense<0.000000e+00> : vector<8xf32>
    %36 = vector.multi_reduction <add>, %35, %cst_20 [1] : vector<8x8xf32> to vector<8xf32>
    %37 = vector.shape_cast %36 : vector<8xf32> to vector<8x1xf32>
    %38 = tpu.reciprocal %37 {approx = true} : vector<8x1xf32> -> vector<8x1xf32>
    %39 = vector.broadcast %38 : vector<8x1xf32> to vector<8x8xf32>
    %40 = arith.mulf %35, %39 : vector<8x8xf32>
    %41 = arith.truncf %40 : vector<8x8xf32> to vector<8x8xbf16>
    %cst_21 = arith.constant dense<0.000000e+00> : vector<8x8xf32>
    %42 = tpu.matmul %41, %27, %cst_21 {dimension_numbers = #tpu.dot_dimension_numbers<[1], [0], [0], [1], [0, 0, 1, 1], [], []>} : vector<8x8xbf16>, vector<8x8xbf16>, vector<8x8xf32> -> vector<8x8xf32>
    %43 = arith.truncf %42 : vector<8x8xf32> to vector<8x8xbf16>
    %c0_22 = arith.constant 0 : index
    %c0_23 = arith.constant 0 : index
    %c0_24 = arith.constant 0 : index
    %44 = vector.load %arg6[%c0_22, %c0_23, %c0_24] : memref<1x8x32xbf16, #tpu.memory_space<vmem>>, vector<1x8x8xbf16>
    %45 = vector.shape_cast %44 : vector<1x8x8xbf16> to vector<8x8xbf16>
    %46 = vector.shape_cast %43 : vector<8x8xbf16> to vector<1x8x8xbf16>
    tpu.vector_store %arg6[%c0_22, %c0_23, %c0_24], %46 {strides = array<i32>} : memref<1x8x32xbf16, #tpu.memory_space<vmem>>, vector<1x8x8xbf16>,
    %c0_25 = arith.constant 0 : index
    %c0_26 = arith.constant 0 : index
    %c8 = arith.constant 8 : index
    %47 = vector.load %arg1[%c0_25, %c0_26, %c8] : memref<1x8x96xbf16, #tpu.memory_space<vmem>>, vector<1x8x8xbf16>
    %48 = vector.shape_cast %47 : vector<1x8x8xbf16> to vector<8x8xbf16>
    %49 = arith.extf %48 : vector<8x8xbf16> to vector<8x8xf32>
    %50 = vector.broadcast %1 : vector<1x8xf32> to vector<8x8xf32>
    %51 = arith.mulf %49, %50 : vector<8x8xf32>
    %c4_i32_27 = arith.constant 4 : i32
    %52 = tpu.dynamic_rotate %49 by %c4_i32_27 dim 1 : vector<8x8xf32>, i32 -> vector<8x8xf32>
    %53 = vector.broadcast %3 : vector<1x8xf32> to vector<8x8xf32>
    %54 = arith.mulf %52, %53 : vector<8x8xf32>
    %55 = arith.addf %51, %54 : vector<8x8xf32>
    %c0_28 = arith.constant 0 : index
    %c0_29 = arith.constant 0 : index
    %c40 = arith.constant 40 : index
    %56 = vector.load %arg1[%c0_28, %c0_29, %c40] : memref<1x8x96xbf16, #tpu.memory_space<vmem>>, vector<1x8x8xbf16>
    %57 = vector.shape_cast %56 : vector<1x8x8xbf16> to vector<8x8xbf16>
    %58 = arith.extf %57 : vector<8x8xbf16> to vector<8x8xf32>
    %59 = vector.broadcast %5 : vector<1x8xf32> to vector<8x8xf32>
    %60 = arith.mulf %58, %59 : vector<8x8xf32>
    %c4_i32_30 = arith.constant 4 : i32
    %61 = tpu.dynamic_rotate %58 by %c4_i32_30 dim 1 : vector<8x8xf32>, i32 -> vector<8x8xf32>
    %62 = vector.broadcast %7 : vector<1x8xf32> to vector<8x8xf32>
    %63 = arith.mulf %61, %62 : vector<8x8xf32>
    %64 = arith.addf %60, %63 : vector<8x8xf32>
    %c0_31 = arith.constant 0 : index
    %c0_32 = arith.constant 0 : index
    %c72 = arith.constant 72 : index
    %65 = vector.load %arg1[%c0_31, %c0_32, %c72] : memref<1x8x96xbf16, #tpu.memory_space<vmem>>, vector<1x8x8xbf16>
    %66 = vector.shape_cast %65 : vector<1x8x8xbf16> to vector<8x8xbf16>
    %67 = arith.truncf %55 : vector<8x8xf32> to vector<8x8xbf16>
    %68 = arith.truncf %64 : vector<8x8xf32> to vector<8x8xbf16>
    %cst_33 = arith.constant dense<0.000000e+00> : vector<8x8xf32>
    %69 = tpu.matmul %67, %68, %cst_33 {dimension_numbers = #tpu.dot_dimension_numbers<[1], [1], [0], [0], [0, 0, 1, 0], [], []>} : vector<8x8xbf16>, vector<8x8xbf16>, vector<8x8xf32> -> vector<8x8xf32>
    %cst_34 = arith.constant dense<0xFF800000> : vector<8xf32>
    %70 = vector.multi_reduction <maximumf>, %69, %cst_34 [1] : vector<8x8xf32> to vector<8xf32>
    %71 = vector.shape_cast %70 : vector<8xf32> to vector<8x1xf32>
    %72 = vector.broadcast %71 : vector<8x1xf32> to vector<8x8xf32>
    %73 = arith.subf %69, %72 : vector<8x8xf32>
    %74 = math.exp %73 : vector<8x8xf32>
    %cst_35 = arith.constant dense<0.000000e+00> : vector<8xf32>
    %75 = vector.multi_reduction <add>, %74, %cst_35 [1] : vector<8x8xf32> to vector<8xf32>
    %76 = vector.shape_cast %75 : vector<8xf32> to vector<8x1xf32>
    %77 = tpu.reciprocal %76 {approx = true} : vector<8x1xf32> -> vector<8x1xf32>
    %78 = vector.broadcast %77 : vector<8x1xf32> to vector<8x8xf32>
    %79 = arith.mulf %74, %78 : vector<8x8xf32>
    %80 = arith.truncf %79 : vector<8x8xf32> to vector<8x8xbf16>
    %cst_36 = arith.constant dense<0.000000e+00> : vector<8x8xf32>
    %81 = tpu.matmul %80, %66, %cst_36 {dimension_numbers = #tpu.dot_dimension_numbers<[1], [0], [0], [1], [0, 0, 1, 1], [], []>} : vector<8x8xbf16>, vector<8x8xbf16>, vector<8x8xf32> -> vector<8x8xf32>
    %82 = arith.truncf %81 : vector<8x8xf32> to vector<8x8xbf16>
    %c0_37 = arith.constant 0 : index
    %c0_38 = arith.constant 0 : index
    %c8_39 = arith.constant 8 : index
    %83 = vector.load %arg6[%c0_37, %c0_38, %c8_39] : memref<1x8x32xbf16, #tpu.memory_space<vmem>>, vector<1x8x8xbf16>
    %84 = vector.shape_cast %83 : vector<1x8x8xbf16> to vector<8x8xbf16>
    %85 = vector.shape_cast %82 : vector<8x8xbf16> to vector<1x8x8xbf16>
    tpu.vector_store %arg6[%c0_37, %c0_38, %c8_39], %85 {strides = array<i32>} : memref<1x8x32xbf16, #tpu.memory_space<vmem>>, vector<1x8x8xbf16>,
    %c0_40 = arith.constant 0 : index
    %c0_41 = arith.constant 0 : index
    %c16 = arith.constant 16 : index
    %86 = vector.load %arg1[%c0_40, %c0_41, %c16] : memref<1x8x96xbf16, #tpu.memory_space<vmem>>, vector<1x8x8xbf16>
    %87 = vector.shape_cast %86 : vector<1x8x8xbf16> to vector<8x8xbf16>
    %88 = arith.extf %87 : vector<8x8xbf16> to vector<8x8xf32>
    %89 = vector.broadcast %1 : vector<1x8xf32> to vector<8x8xf32>
    %90 = arith.mulf %88, %89 : vector<8x8xf32>
    %c4_i32_42 = arith.constant 4 : i32
    %91 = tpu.dynamic_rotate %88 by %c4_i32_42 dim 1 : vector<8x8xf32>, i32 -> vector<8x8xf32>
    %92 = vector.broadcast %3 : vector<1x8xf32> to vector<8x8xf32>
    %93 = arith.mulf %91, %92 : vector<8x8xf32>
    %94 = arith.addf %90, %93 : vector<8x8xf32>
    %c0_43 = arith.constant 0 : index
    %c0_44 = arith.constant 0 : index
    %c48 = arith.constant 48 : index
    %95 = vector.load %arg1[%c0_43, %c0_44, %c48] : memref<1x8x96xbf16, #tpu.memory_space<vmem>>, vector<1x8x8xbf16>
    %96 = vector.shape_cast %95 : vector<1x8x8xbf16> to vector<8x8xbf16>
    %97 = arith.extf %96 : vector<8x8xbf16> to vector<8x8xf32>
    %98 = vector.broadcast %5 : vector<1x8xf32> to vector<8x8xf32>
    %99 = arith.mulf %97, %98 : vector<8x8xf32>
    %c4_i32_45 = arith.constant 4 : i32
    %100 = tpu.dynamic_rotate %97 by %c4_i32_45 dim 1 : vector<8x8xf32>, i32 -> vector<8x8xf32>
    %101 = vector.broadcast %7 : vector<1x8xf32> to vector<8x8xf32>
    %102 = arith.mulf %100, %101 : vector<8x8xf32>
    %103 = arith.addf %99, %102 : vector<8x8xf32>
    %c0_46 = arith.constant 0 : index
    %c0_47 = arith.constant 0 : index
    %c80 = arith.constant 80 : index
    %104 = vector.load %arg1[%c0_46, %c0_47, %c80] : memref<1x8x96xbf16, #tpu.memory_space<vmem>>, vector<1x8x8xbf16>
    %105 = vector.shape_cast %104 : vector<1x8x8xbf16> to vector<8x8xbf16>
    %106 = arith.truncf %94 : vector<8x8xf32> to vector<8x8xbf16>
    %107 = arith.truncf %103 : vector<8x8xf32> to vector<8x8xbf16>
    %cst_48 = arith.constant dense<0.000000e+00> : vector<8x8xf32>
    %108 = tpu.matmul %106, %107, %cst_48 {dimension_numbers = #tpu.dot_dimension_numbers<[1], [1], [0], [0], [0, 0, 1, 0], [], []>} : vector<8x8xbf16>, vector<8x8xbf16>, vector<8x8xf32> -> vector<8x8xf32>
    %cst_49 = arith.constant dense<0xFF800000> : vector<8xf32>
    %109 = vector.multi_reduction <maximumf>, %108, %cst_49 [1] : vector<8x8xf32> to vector<8xf32>
    %110 = vector.shape_cast %109 : vector<8xf32> to vector<8x1xf32>
    %111 = vector.broadcast %110 : vector<8x1xf32> to vector<8x8xf32>
    %112 = arith.subf %108, %111 : vector<8x8xf32>
    %113 = math.exp %112 : vector<8x8xf32>
    %cst_50 = arith.constant dense<0.000000e+00> : vector<8xf32>
    %114 = vector.multi_reduction <add>, %113, %cst_50 [1] : vector<8x8xf32> to vector<8xf32>
    %115 = vector.shape_cast %114 : vector<8xf32> to vector<8x1xf32>
    %116 = tpu.reciprocal %115 {approx = true} : vector<8x1xf32> -> vector<8x1xf32>
    %117 = vector.broadcast %116 : vector<8x1xf32> to vector<8x8xf32>
    %118 = arith.mulf %113, %117 : vector<8x8xf32>
    %119 = arith.truncf %118 : vector<8x8xf32> to vector<8x8xbf16>
    %cst_51 = arith.constant dense<0.000000e+00> : vector<8x8xf32>
    %120 = tpu.matmul %119, %105, %cst_51 {dimension_numbers = #tpu.dot_dimension_numbers<[1], [0], [0], [1], [0, 0, 1, 1], [], []>} : vector<8x8xbf16>, vector<8x8xbf16>, vector<8x8xf32> -> vector<8x8xf32>
    %121 = arith.truncf %120 : vector<8x8xf32> to vector<8x8xbf16>
    %c0_52 = arith.constant 0 : index
    %c0_53 = arith.constant 0 : index
    %c16_54 = arith.constant 16 : index
    %122 = vector.load %arg6[%c0_52, %c0_53, %c16_54] : memref<1x8x32xbf16, #tpu.memory_space<vmem>>, vector<1x8x8xbf16>
    %123 = vector.shape_cast %122 : vector<1x8x8xbf16> to vector<8x8xbf16>
    %124 = vector.shape_cast %121 : vector<8x8xbf16> to vector<1x8x8xbf16>
    tpu.vector_store %arg6[%c0_52, %c0_53, %c16_54], %124 {strides = array<i32>} : memref<1x8x32xbf16, #tpu.memory_space<vmem>>, vector<1x8x8xbf16>,
    %c0_55 = arith.constant 0 : index
    %c0_56 = arith.constant 0 : index
    %c24 = arith.constant 24 : index
    %125 = vector.load %arg1[%c0_55, %c0_56, %c24] : memref<1x8x96xbf16, #tpu.memory_space<vmem>>, vector<1x8x8xbf16>
    %126 = vector.shape_cast %125 : vector<1x8x8xbf16> to vector<8x8xbf16>
    %127 = arith.extf %126 : vector<8x8xbf16> to vector<8x8xf32>
    %128 = vector.broadcast %1 : vector<1x8xf32> to vector<8x8xf32>
    %129 = arith.mulf %127, %128 : vector<8x8xf32>
    %c4_i32_57 = arith.constant 4 : i32
    %130 = tpu.dynamic_rotate %127 by %c4_i32_57 dim 1 : vector<8x8xf32>, i32 -> vector<8x8xf32>
    %131 = vector.broadcast %3 : vector<1x8xf32> to vector<8x8xf32>
    %132 = arith.mulf %130, %131 : vector<8x8xf32>
    %133 = arith.addf %129, %132 : vector<8x8xf32>
    %c0_58 = arith.constant 0 : index
    %c0_59 = arith.constant 0 : index
    %c56 = arith.constant 56 : index
    %134 = vector.load %arg1[%c0_58, %c0_59, %c56] : memref<1x8x96xbf16, #tpu.memory_space<vmem>>, vector<1x8x8xbf16>
    %135 = vector.shape_cast %134 : vector<1x8x8xbf16> to vector<8x8xbf16>
    %136 = arith.extf %135 : vector<8x8xbf16> to vector<8x8xf32>
    %137 = vector.broadcast %5 : vector<1x8xf32> to vector<8x8xf32>
    %138 = arith.mulf %136, %137 : vector<8x8xf32>
    %c4_i32_60 = arith.constant 4 : i32
    %139 = tpu.dynamic_rotate %136 by %c4_i32_60 dim 1 : vector<8x8xf32>, i32 -> vector<8x8xf32>
    %140 = vector.broadcast %7 : vector<1x8xf32> to vector<8x8xf32>
    %141 = arith.mulf %139, %140 : vector<8x8xf32>
    %142 = arith.addf %138, %141 : vector<8x8xf32>
    %c0_61 = arith.constant 0 : index
    %c0_62 = arith.constant 0 : index
    %c88 = arith.constant 88 : index
    %143 = vector.load %arg1[%c0_61, %c0_62, %c88] : memref<1x8x96xbf16, #tpu.memory_space<vmem>>, vector<1x8x8xbf16>
    %144 = vector.shape_cast %143 : vector<1x8x8xbf16> to vector<8x8xbf16>
    %145 = arith.truncf %133 : vector<8x8xf32> to vector<8x8xbf16>
    %146 = arith.truncf %142 : vector<8x8xf32> to vector<8x8xbf16>
    %cst_63 = arith.constant dense<0.000000e+00> : vector<8x8xf32>
    %147 = tpu.matmul %145, %146, %cst_63 {dimension_numbers = #tpu.dot_dimension_numbers<[1], [1], [0], [0], [0, 0, 1, 0], [], []>} : vector<8x8xbf16>, vector<8x8xbf16>, vector<8x8xf32> -> vector<8x8xf32>
    %cst_64 = arith.constant dense<0xFF800000> : vector<8xf32>
    %148 = vector.multi_reduction <maximumf>, %147, %cst_64 [1] : vector<8x8xf32> to vector<8xf32>
    %149 = vector.shape_cast %148 : vector<8xf32> to vector<8x1xf32>
    %150 = vector.broadcast %149 : vector<8x1xf32> to vector<8x8xf32>
    %151 = arith.subf %147, %150 : vector<8x8xf32>
    %152 = math.exp %151 : vector<8x8xf32>
    %cst_65 = arith.constant dense<0.000000e+00> : vector<8xf32>
    %153 = vector.multi_reduction <add>, %152, %cst_65 [1] : vector<8x8xf32> to vector<8xf32>
    %154 = vector.shape_cast %153 : vector<8xf32> to vector<8x1xf32>
    %155 = tpu.reciprocal %154 {approx = true} : vector<8x1xf32> -> vector<8x1xf32>
    %156 = vector.broadcast %155 : vector<8x1xf32> to vector<8x8xf32>
    %157 = arith.mulf %152, %156 : vector<8x8xf32>
    %158 = arith.truncf %157 : vector<8x8xf32> to vector<8x8xbf16>
    %cst_66 = arith.constant dense<0.000000e+00> : vector<8x8xf32>
    %159 = tpu.matmul %158, %144, %cst_66 {dimension_numbers = #tpu.dot_dimension_numbers<[1], [0], [0], [1], [0, 0, 1, 1], [], []>} : vector<8x8xbf16>, vector<8x8xbf16>, vector<8x8xf32> -> vector<8x8xf32>
    %160 = arith.truncf %159 : vector<8x8xf32> to vector<8x8xbf16>
    %c0_67 = arith.constant 0 : index
    %c0_68 = arith.constant 0 : index
    %c24_69 = arith.constant 24 : index
    %161 = vector.load %arg6[%c0_67, %c0_68, %c24_69] : memref<1x8x32xbf16, #tpu.memory_space<vmem>>, vector<1x8x8xbf16>
    %162 = vector.shape_cast %161 : vector<1x8x8xbf16> to vector<8x8xbf16>
    %163 = vector.shape_cast %160 : vector<8x8xbf16> to vector<1x8x8xbf16>
    tpu.vector_store %arg6[%c0_67, %c0_68, %c24_69], %163 {strides = array<i32>} : memref<1x8x32xbf16, #tpu.memory_space<vmem>>, vector<1x8x8xbf16>,
    return
  }
  func.func @transform_0(%arg0: i32) -> (i32, i32, i32) {
    %c0_i32 = arith.constant 0 : i32
    %c0_i32_0 = arith.constant 0 : i32
    %c0_i32_1 = arith.constant 0 : i32
    return %arg0, %c0_i32, %c0_i32_0 : i32, i32, i32
  }
  func.func @transform_1(%arg0: i32) -> (i32, i32, i32) {
    %c0_i32 = arith.constant 0 : i32
    %c0_i32_0 = arith.constant 0 : i32
    %c0_i32_1 = arith.constant 0 : i32
    return %arg0, %c0_i32, %c0_i32_0 : i32, i32, i32
  }
  func.func @transform_2(%arg0: i32) -> (i32, i32, i32) {
    %c0_i32 = arith.constant 0 : i32
    %c0_i32_0 = arith.constant 0 : i32
    %c0_i32_1 = arith.constant 0 : i32
    return %arg0, %c0_i32, %c0_i32_0 : i32, i32, i32
  }
  func.func @transform_3(%arg0: i32) -> (i32, i32, i32) {
    %c0_i32 = arith.constant 0 : i32
    %c0_i32_0 = arith.constant 0 : i32
    %c0_i32_1 = arith.constant 0 : i32
    return %arg0, %c0_i32, %c0_i32_0 : i32, i32, i32
  }
  func.func @transform_4(%arg0: i32) -> (i32, i32, i32) {
    %c0_i32 = arith.constant 0 : i32
    %c0_i32_0 = arith.constant 0 : i32
    %c0_i32_1 = arith.constant 0 : i32
    return %arg0, %c0_i32, %c0_i32_0 : i32, i32, i32
  }
  func.func @transform_5(%arg0: i32) -> (i32, i32, i32) {
    %c0_i32 = arith.constant 0 : i32
    %c0_i32_0 = arith.constant 0 : i32
    %c0_i32_1 = arith.constant 0 : i32
    return %arg0, %c0_i32, %c0_i32_0 : i32, i32, i32
  }
}

</mosaic_0001>

<bundles_post_ra>
// kernel: rope_mha_forward.3
= control target key start
LH: loop header
LB: loop body
LE: loop exit
PB: predicated region body
PF: predicated region fallthrough
CT: control target
= control target key end

     0   :  { %vm73_vm0 = vcmask 261120   ;;  %vm19_vm1 = vcmask 785408   ;;  %v215_v0 = vmov 0.0   ;;  %vm216_vm2 = vmmov 0   ;;  %s278_s1 = inlined_call_operand.vmem [shape: bf16[96,32], index: 1, kind: input, shape index: {}]   ;;  %s279_s0 = inlined_call_operand.vmem [shape: bf16[16,32], index: 0, kind: input, shape index: {}]   ;;  %s280_s2 = inlined_call_operand.vmem [shape: f32[1,96], index: 2, kind: input, shape index: {}]   ;;  %s281_s3 = inlined_call_operand.vmem [shape: bf16[16,96], index: 3, kind: output, shape index: {}]  }
   0x1   :  { %190 = vmatprep.subr.bf16.mxu0 %v215_v0  ;;  %v208_v1 = vld [vmem:[%s278_s1] sm:$0xff]   ;;  %202 = vmatprep.mubr.msk.bf16.mxu0 %vm216_vm2, %v215_v0  ;;  %20 = vst.msk [vmem:[#allocation2] sm:$0xff] %vm19_vm1, %v215_v0  ;;  %21 = vst.msk [vmem:[#allocation2 + $0x8] sm:$0xff] %vm19_vm1, %v215_v0  ;;  %v209_v3 = vld [vmem:[%s278_s1 + $0x8] sm:$0xff]   ;;  %vm163_vm3 = vcmask 781312  }
   0x2   :  { %v78_v2 = vsel %vm73_vm0, %v208_v1, 0  ;;  %v81_v4 = vsel %vm73_vm0, %v209_v3, 0  ;;  %v210_v5 = vld [vmem:[%s278_s1 + $0x10] sm:$0xff]   ;;  %v211_v7 = vld [vmem:[%s278_s1 + $0x18] sm:$0xff]   ;;  %v212_v9 = vld [vmem:[%s278_s1 + $0x20] sm:$0xff]  }
   0x3   :  { %191 = vmatpush3.bf16.xpose.msra.mxu0 %v78_v2  ;;  %v84_v6 = vsel %vm73_vm0, %v210_v5, 0  ;;  %v87_v8 = vsel %vm73_vm0, %v211_v7, 0  ;;  %v90_v10 = vsel %vm73_vm0, %v212_v9, 0  ;;  %v213_v11 = vld [vmem:[%s278_s1 + $0x28] sm:$0xff]   ;;  %v214_v13 = vld [vmem:[%s279_s0] sm:$0xff]  }
   0x4   :  { %192 = vmatprep.subr.bf16.mxu0 %v215_v0  ;;  %v93_v12 = vsel %vm73_vm0, %v213_v11, 0  ;;  %v178_v22 = vld [vmem:[%s280_s2] ss:$0 sm:$0xff] }
   0x8   :  { %v22_v14 = vld [vmem:[#allocation2] sm:$0xff]  ;;  %v23_v16 = vld [vmem:[#allocation2 + $0x8] sm:$0xff] }
   0xb   :  { %193 = vmatpush3.bf16.xpose.msra.mxu0 %v81_v4 }
   0xc   :  { %194 = vmatprep.subr.bf16.mxu0 %v215_v0 }
  0x13   :  { %195 = vmatpush3.bf16.xpose.msra.mxu0 %v84_v6 }
  0x14   :  { %196 = vmatprep.subr.bf16.mxu0 %v215_v0 }
  0x1b   :  { %197 = vmatpush3.bf16.xpose.msra.mxu0 %v87_v8 }
  0x1c   :  { %198 = vmatprep.subr.bf16.mxu0 %v215_v0 }
  0x23   :  { %199 = vmatpush3.bf16.xpose.msra.mxu0 %v90_v10 }
  0x24   :  { %200 = vmatprep.subr.bf16.mxu0 %v215_v0 }
  0x2b   :  { %201 = vmatpush3.bf16.xpose.msra.mxu0 %v93_v12 }
  0x32   :  { %203 = vmatmul.mubr.msk.bf16.vlgmr.msra.gmra.mrb[0].mxu0 %vm73_vm0, %v214_v13 }
 0x105   :  { %v129_v15 = vpop.f32.mrb[0].mxu0 }
 0x106   :  { %v136_v17 = vadd.f32 %v129_v15, %v22_v14  ;;  %v204_v18 = vpop.f32.mrb[1].mxu0 }
 0x107   :  { %v132_v19 = vpop.f32.mrb[2].mxu0 }
 0x108   :  { %139 = vst.msk [vmem:[#allocation2] sm:$0xff] %vm19_vm1, %v136_v17  ;;  %v137_v20 = vadd.f32 %v132_v19, %v23_v16  ;;  %v205_v21 = vpop.f32.mrb[3].mxu0 }
 0x10a   :  { %140 = vst.msk [vmem:[#allocation2 + $0x8] sm:$0xff] %vm19_vm1, %v137_v20 }
 0x10f   :  { %v144_v23 = vld [vmem:[#allocation2] sm:$0xff] }
 0x110   :  { %v153_v24 = vadd.f32 %v178_v22, %v144_v23 }
 0x111   :  { %v145_v25 = vld [vmem:[#allocation2 + $0x8] sm:$0xff] }
 0x112   :  { %v181_v26 = vpack.c.bf16 %v153_v24, %v153_v24  ;;  %v154_v27 = vadd.f32 %v178_v22, %v145_v25 }
 0x114   :  { %164 = vst.msk [vmem:[%s281_s3] sm:$0xf] %vm163_vm3, %v181_v26  ;;  %v182_v28 = vpack.c.bf16 %v154_v27, %v154_v27 }
 0x116   :  { %165 = vst.msk [vmem:[%s281_s3 + $0x4] sm:$0xf] %vm163_vm3, %v182_v28 }

// kernel: rope_mha_forward.5
= control target key start
LH: loop header
LB: loop body
LE: loop exit
PB: predicated region body
PF: predicated region fallthrough
CT: control target
= control target key end

     0   :  { %vm20_vm0 = vcmask 261120   ;;  %v181_v0 = vmov 0.0   ;;  %vm182_vm1 = vmmov 0   ;;  %s239_s0 = inlined_call_operand.vmem [shape: bf16[16,32], index: 0, kind: input, shape index: {}]   ;;  %s240_s1 = inlined_call_operand.vmem [shape: bf16[32,32], index: 1, kind: input, shape index: {}]   ;;  %s241_s2 = inlined_call_operand.vmem [shape: f32[1,32], index: 2, kind: input, shape index: {}]   ;;  %s242_s3 = inlined_call_operand.hbm [shape: f32[16,32], index: 3, kind: output, shape index: {}]  }
   0x1   :  { %141 = vmatprep.subr.bf16.mxu0 %v181_v0  ;;  %v154_v1 = vld [vmem:[%s240_s1] sm:$0xff]   ;;  %21 = vst.msk [vmem:[#allocation2] sm:$0xff] %vm20_vm0, %v181_v0  ;;  %22 = vst.msk [vmem:[#allocation2 + $0x8] sm:$0xff] %vm20_vm0, %v181_v0  ;;  %145 = vmatprep.mubr.msk.bf16.mxu0 %vm182_vm1, %v181_v0 }
   0x2   :  { %v51_v2 = vsel %vm20_vm0, %v154_v1, 0 }
   0x3   :  { %8 = vsyncpa [#allocation4], 0  ;;  %142 = vmatpush3.bf16.xpose.msra.mxu0 %v51_v2  ;;  %v155_v3 = vld [vmem:[%s240_s1 + $0x8] sm:$0xff]   ;;  %v156_v5 = vld [vmem:[%s239_s0] sm:$0xff]   ;;  %s183_s19 = smov [#allocation3]  }
   0x4   :  { %143 = vmatprep.subr.bf16.mxu0 %v181_v0  ;;  %v54_v4 = vsel %vm20_vm0, %v155_v3, 0  ;;  %v137_v14 = vld [vmem:[%s241_s2] ss:$0 sm:$0xff]  ;;  %s122_s0 = sshll.u32 %s183_s19, 4  ;;  %s123_s0 = int_to_ptr.vmem [resolvable:$true] %s122_s0 }
   0x5   :  { %s157_s20 = scalar_lea.vmem %s123_s0, 256  ;;  %p162_p1 = scmp.lt.s32.totalorder %s123_s0, %s123_s0 }
   0x6   :  { %p158_p0 = scmp.ne.s32.totalorder %s123_s0, %s157_s20  ;;  %p163_p2 = scmp.lt.s32.totalorder %s157_s20, %s157_s20 }
   0x8   :  { %v23_v6 = vld [vmem:[#allocation2] sm:$0xff]  ;;  %v24_v8 = vld [vmem:[#allocation2 + $0x8] sm:$0xff]  ;;  %p164_p3 = por %p163_p2, %p162_p1 }
   0xa   :  { %p165_p4 = pnand %p164_p3, %p158_p0 }
   0xb   :  { %144 = vmatpush3.bf16.xpose.msra.mxu0 %v54_v4 }
  0x12   :  { %146 = vmatmul.mubr.msk.bf16.vlgmr.msra.gmra.mrb[0].mxu0 %vm20_vm0, %v156_v5 }
  0xe5   :  { %v90_v7 = vpop.f32.mrb[0].mxu0 }
  0xe6   :  { %v97_v9 = vadd.f32 %v90_v7, %v23_v6  ;;  %v147_v10 = vpop.f32.mrb[1].mxu0 }
  0xe7   :  { %v93_v11 = vpop.f32.mrb[2].mxu0 }
  0xe8   :  { %99 = vst.msk [vmem:[#allocation2] sm:$0xff] %vm20_vm0, %v97_v9  ;;  %v98_v12 = vadd.f32 %v93_v11, %v24_v8  ;;  %v148_v13 = vpop.f32.mrb[3].mxu0 }
  0xea   :  { %100 = vst.msk [vmem:[#allocation2 + $0x8] sm:$0xff] %vm20_vm0, %v98_v12 }
  0xef   :  { %v104_v15 = vld [vmem:[#allocation2] sm:$0xff] }
  0xf0   :  { %v113_v16 = vadd.f32 %v137_v14, %v104_v15 }
  0xf1   :  { %v105_v17 = vld [vmem:[#allocation2 + $0x8] sm:$0xff] }
  0xf2   :  { %v114_v18 = vadd.f32 %v137_v14, %v105_v17  ;;  %115 = vst.msk [vmem:[#allocation3] sm:$0xff] %vm20_vm0, %v113_v16 }
  0xf4   :  { %116 = vst.msk [vmem:[#allocation3 + $0x8] sm:$0xff] %vm20_vm0, %v114_v18 }
  0xf5   :  { %168 = shalt.err (!%p165_p4)
}
  0xf6   :  { %s169_s22 = scalar_lea.hbm %s242_s3, 256 }
  0xf7   :  { %p170_p5 = scmp.ne.s32.totalorder %s242_s3, %s169_s22  ;;  %p173_p6 = scmp.lt.u32.totalorder %s169_s22, %s242_s3 }
  0xf9   :  { %p175_p7 = pnand %p173_p6, %p170_p5 }
  0xfb   :  { %178 = shalt.err (!%p175_p7)
}
  0xfc   :  { %s184_s27 = smov 128   ;;  %s185_s28 = smov 8  }
  0xfd   :  { %128 = dma.vmem_to_hbm [thread:$0]  %s123_s0, 256, %s242_s3, [#allocation4], %s184_s27, %s184_s27, %s185_s28  }
  0xfe   :  { %179 = dma.done.wait [#allocation4], 256  }
  0xff   :  { %180 = vsyncadd [#allocation4], 4294967040 }
 0x100   :  { %132 = vsyncpa [#allocation4], 1 }

// kernel: rope_mha_forward.4
= control target key start
LH: loop header
LB: loop body
LE: loop exit
PB: predicated region body
PF: predicated region fallthrough
CT: control target
= control target key end

     0   :  { %s1281_s18 = smov 0   ;;  %s1513_s0 = inlined_call_operand.vmem [shape: bf16[2,8,96], index: 0, kind: input, shape index: {}]   ;;  %s1514_s1 = inlined_call_operand.vmem [shape: f32[2,1,8], index: 1, kind: input, shape index: {}]   ;;  %s1515_s2 = inlined_call_operand.vmem [shape: f32[2,1,8], index: 2, kind: input, shape index: {}]   ;;  %s1516_s3 = inlined_call_operand.vmem [shape: f32[2,1,8], index: 3, kind: input, shape index: {}]   ;;  %s1517_s4 = inlined_call_operand.vmem [shape: f32[2,1,8], index: 4, kind: input, shape index: {}]   ;;  %s1518_s5 = inlined_call_operand.vmem [shape: bf16[2,8,32], index: 5, kind: output, shape index: {}]  }
   0x1 LB: > { %s1053_s19 = sadd.s32 4294967295, %s1224_s18   ;;  %p1057_p0 = scmp.ge.s32.totalorder %s1224_s18, 1  ;;  %s1224_s18 = sphi %s1281_s18, %s15_s18  }
   0x2   : > { %p218_p1 = scmp.lt.s32.totalorder %s1224_s18, 3 }
   0x4   : > { %p219_p2 = pnand %p1057_p0, %p218_p1 }
   0x5   : > { %p256_p3 = scmp.lt.s32.totalorder (!%p219_p2), %s1053_s19, 1  ;;  %s1226_s24 = smov (!%p219_p2), 96   ;;  %vm290_vm0 = vcmask (!%p219_p2), 1047616   ;;  %v1231_v14 = vmov (!%p219_p2), 0.0   ;;  %vm1232_vm1 = vmmov (!%p219_p2), 0   ;;  %vm349_vm2 = vcmask (!%p219_p2), 64512  }
   0x6   : > { %222 = sbr.rel (%p219_p2) target bundleno = 2068 (0x814), region = 40  ;;  %s1227_s25 = smov (!%p219_p2), 8   ;;  %1100 = vmatprep.subr.bf16.mxu0 (!%p219_p2), %v1231_v14  ;;  %1106 = vmatprep.subr.bf16.mxu1 (!%p219_p2), %v1231_v14  ;;  %vm416_vm3 = vcmask (!%p219_p2), 1043456   ;;  %vm461_vm4 = vcmask (!%p219_p2), 60416   ;;  %vm628_vm5 = vcmask (!%p219_p2), 126016   ;;  %vm795_vm6 = vcmask (!%p219_p2), 191616  }
   0x7   : > { %s1228_s7 = smov (!%p219_p2), 4   ;;  %s1229_s8 = smov (!%p219_p2), 32   ;;  %1102 = vmatprep.mubr.msk.bf16.mxu0 (!%p219_p2), %vm1232_vm1, %v1231_v14  ;;  %1108 = vmatprep.mubr.msk.bf16.mxu1 (!%p219_p2), %vm1232_vm1, %v1231_v14  ;;  %vm962_vm7 = vcmask (!%p219_p2), 257216  }
   0x8   : > { %s1230_s12 = smov (!%p219_p2), 28   ;;  %s1233_s13 = smov (!%p219_p2), 124  }
   0x9   : > { %s1234_s14 = smov (!%p219_p2), 88   ;;  %s1235_s15 = smov (!%p219_p2), 120  }
   0xa   : > { %s1236_s16 = smov (!%p219_p2), 80   ;;  %s1237_s17 = smov (!%p219_p2), 112  }
   0xb   : > { %s1238_s21 = smov (!%p219_p2), 72   ;;  %s1239_s22 = smov (!%p219_p2), 104  }
   0xc   : > { %s1240_s27 = smov (!%p219_p2), 40   ;;  %s1242_s29 = smov (!%p219_p2), 44  }
   0xd   : > { %s1520_s19 = smov (!%p256_p3, %s1053_s19), 1  ;;  %s1243_s30 = smov 48  }
   0xe   : > { %s1058_s20 = sshll.u32 %s1520_s19, 2  ;;  %s271_s28 = scalar_lea.vmem %s1517_s4, %s1520_s19 }
   0xf   : > { %s1297_s23 = scalar_lea.vmem %s1513_s0, %s1058_s20  ;;  %v1063_v5 = vld [vmem:[%s271_s28] ss:$0 sm:$0xff]  ;;  %s268_s6 = scalar_lea.vmem %s1516_s3, %s1520_s19 }
  0x10   : > { %v1300_v0 = vld [vmem:[%s1297_s23] sm:$0xf]  ;;  %s265_s11 = scalar_lea.vmem %s1515_s2, %s1520_s19  ;;  %s262_s26 = scalar_lea.vmem %s1514_s1, %s1520_s19 }
  0x11   : > { %v1303_v1 = vunpack.c.l.bf16 %v1300_v0  ;;  %v1321_v6 = vld [vmem:[%s268_s6] ss:$0 sm:$0xff]  ;;  %s1241_s28 = smov 36   ;;  %s1244_s6 = smov 16  }
  0x12   : > { %v1061_v13 = vld [vmem:[%s265_s11] ss:$0 sm:$0xff]  ;;  %s1246_s9 = smov 12   ;;  %s1248_s10 = smov 24  }
  0x13   : > { %321 = vrot.lane.b32.xlu0 %v1303_v1, %s1226_s24  ;;  %v1346_v21 = vld [vmem:[%s1297_s23] sm:$0xf]  ;;  %s1249_s11 = smov 20  }
  0x14   : > { %v1352_v24 = vunpack.c.l.bf16 %v1346_v21  ;;  %v1356_v26 = vld [vmem:[%s1297_s23] sm:$0xf] }
  0x15   : > { %v1361_v27 = vunpack.c.l.bf16 %v1356_v26  ;;  %v1364_v28 = vld [vmem:[%s1297_s23] sm:$0xf] }
  0x16   : > { %v1371_v29 = vunpack.c.l.bf16 %v1364_v28  ;;  %v1383_v30 = vld [vmem:[%s262_s26] ss:$0 sm:$0xff] }
  0x17   : > { %v289_v31 = vmul.f32 %v1383_v30, %v1303_v1 }
  0x85   : > { %v322_v2 = vpop.permute.xlu0 %321 }
  0x86   : > { %324 = vrot.lane.b32.xlu0 %v322_v2, %s1227_s25 }
  0x8a   : > { %291 = vrot.lane.b32.xlu0 %v1303_v1, %s1227_s25 }
  0xf8   : > { %v325_v3 = vpop.permute.xlu0 %324 }
  0xf9   : > { %v326_v4 = vsel %vm290_vm0, %v325_v3, %v322_v2 }
  0xfa   : > { %327 = vrot.lane.b32.xlu1 %v326_v4, %s1227_s25 }
  0xfc   : > { %v292_v7 = vpop.permute.xlu0 %291 }
  0xfd   : > { %v293_v8 = vsel %vm290_vm0, %v292_v7, %v1303_v1 }
  0xfe   : > { %335 = vrot.lane.b32.xlu1 %v1063_v5, %s1228_s7 }
 0x102   : > { %316 = vrot.lane.b32.xlu1 %v1321_v6, %s1229_s8  ;;  %s1245_s8 = smov 56  }
 0x106   : > { %294 = vrot.lane.b32.xlu1 %v293_v8, %s1227_s25 }
 0x16c   : > { %v328_v9 = vpop.permute.xlu1 %327 }
 0x16d   : > { %v329_v10 = vsel %vm290_vm0, %v328_v9, %v322_v2 }
 0x170   : > { %v1328_v11 = vpop.permute.xlu1 %335 }
 0x171   : > { %v338_v12 = vmul.f32 %v1328_v11, %v329_v10 }
 0x173   : > { %340 = vrot.lane.b32.xlu0 %v338_v12, %s1230_s12  ;;  %s1250_s12 = smov 64  }
 0x174   : > { %v317_v15 = vpop.permute.xlu1 %316 }
 0x175   : > { %v319_v16 = vmul.f32 %v317_v15, %v1303_v1 }
 0x177   : > { %302 = vrot.lane.b32.xlu0 %v1061_v13, %s1228_s7 }
 0x178   : > { %v295_v17 = vpop.permute.xlu1 %294 }
 0x179   : > { %v296_v20 = vsel %vm290_vm0, %v295_v17, %v1303_v1 }
 0x1e5   : > { %v341_v18 = vpop.permute.xlu0 %340 }
 0x1e6   : > { %v343_v19 = vadd.f32 %v341_v18, %v319_v16 }
 0x1e8   : > { %v345_v22 = vpack.c.bf16 %v343_v19, %v343_v19 }
 0x1e9   : > { %v1348_v23 = vpop.permute.xlu0 %302 }
 0x1ea   : > { %347 = vrot.lane.b32.xlu1 %v345_v22, %s1226_s24  ;;  %v305_v25 = vmul.f32 %v1348_v23, %v296_v20 }
 0x1ec   : > { %307 = vrot.lane.b32.xlu0 %v305_v25, %s1233_s13 }
 0x1ee   : > { %489 = vrot.lane.b32.xlu1 %v1352_v24, %s1234_s14 }
 0x1f0   : > { %470 = vrot.lane.b32.xlu0 %v1352_v24, %s1235_s15 }
 0x1f2   : > { %656 = vrot.lane.b32.xlu1 %v1361_v27, %s1236_s16 }
 0x1f4   : > { %637 = vrot.lane.b32.xlu0 %v1361_v27, %s1237_s17 }
 0x1f6   : > { %823 = vrot.lane.b32.xlu1 %v1371_v29, %s1238_s21 }
 0x1f8   : > { %804 = vrot.lane.b32.xlu0 %v1371_v29, %s1239_s22 }
 0x25c   : > { %v348_v32 = vpop.permute.xlu1 %347 }
 0x25d   : > { %v354_v33 = vsel %vm349_vm2, %v348_v32, 0 }
 0x25e   : > { %1101 = vmatpush3.bf16.xpose.msra.mxu0 %v354_v33  ;;  %v308_v34 = vpop.permute.xlu0 %307  ;;  %v1065_v33 = vcombine.low %v1300_v0, %v1300_v0 }
 0x25f   : > { %v310_v35 = vadd.f32 %v308_v34, %v289_v31  ;;  %1118 = vmatprep.subr.bf16.mxu0 %v1231_v14 }
 0x260   : > { %v490_v36 = vpop.permute.xlu1 %489 }
 0x261   : > { %v344_v37 = vpack.c.bf16 %v310_v35, %v310_v35  ;;  %492 = vrot.lane.b32.xlu1 %v490_v36, %s1227_s25 }
 0x262   : > { %v471_v38 = vpop.permute.xlu0 %470 }
 0x264   : > { %v657_v39 = vpop.permute.xlu1 %656 }
 0x265   : > { %v1181_v40 = vpack.i.bf16 %v657_v39, %v471_v38  ;;  %1103 = vmatmul.mubr.msk.bf16.vlgmr.msra.gmra.mrb[0].mxu0 %vm349_vm2, %v344_v37 }
 0x266   : > { %v638_v41 = vpop.permute.xlu0 %637  ;;  %1120 = vmatprep.mubr.msk.bf16.mxu0 %vm1232_vm1, %v1231_v14 }
 0x267   : > { %1182 = vrot.lane.b32.xlu0 %v1181_v40, %s1227_s25 }
 0x268   : > { %v824_v42 = vpop.permute.xlu1 %823 }
 0x269   : > { %v1186_v43 = vpack.i.bf16 %v824_v42, %v638_v41 }
 0x26a   : > { %v1394_v44 = vpop.permute.xlu0 %804 }
 0x26b   : > { %1187 = vrot.lane.b32.xlu1 %v1186_v43, %s1227_s25  ;;  %807 = vrot.lane.b32.xlu0 %v1394_v44, %s1227_s25 }
 0x2d3   : > { %v493_v45 = vpop.permute.xlu1 %492 }
 0x2d4   : > { %v494_v48 = vsel %vm290_vm0, %v493_v45, %v490_v36 }
 0x2d9   : > { %v1183_v46 = vpop.permute.xlu0 %1182 }
 0x2da   : > { %v1184_v47 = vunpack.i.l.bf16 %v1183_v46  ;;  %v1185_v52 = vunpack.i.h.bf16 %v1183_v46 }
 0x2dc   : > { %v475_v49 = vsel %vm290_vm0, %v1184_v47, %v471_v38  ;;  %v661_v55 = vsel %vm290_vm0, %v1185_v52, %v657_v39 }
 0x2dd   : > { %v1188_v50 = vpop.permute.xlu1 %1187  ;;  %v1191_v51 = vpack.i.bf16 %v475_v49, %v494_v48  ;;  %v808_v59 = vpop.permute.xlu0 %807 }
 0x2de   : > { %v1190_v53 = vunpack.i.h.bf16 %v1188_v50  ;;  %v1189_v54 = vunpack.i.l.bf16 %v1188_v50  ;;  %v809_v60 = vsel %vm290_vm0, %v808_v59, %v1394_v44 }
 0x2df   : > { %1192 = vrot.lane.b32.xlu1 %v1191_v51, %s1227_s25 }
 0x2e0   : > { %v642_v56 = vsel %vm290_vm0, %v1189_v54, %v638_v41  ;;  %v828_v57 = vsel %vm290_vm0, %v1190_v53, %v824_v42 }
 0x2e1   : > { %v1196_v58 = vpack.i.bf16 %v828_v57, %v642_v56 }
 0x2e3   : > { %662 = vrot.lane.b32.xlu1 %v661_v55, %s1227_s25 }
 0x2e7   : > { %1197 = vrot.lane.b32.xlu1 %v1196_v58, %s1227_s25 }
 0x2eb   : > { %810 = vrot.lane.b32.xlu1 %v809_v60, %s1227_s25 }
 0x2ef   : > { %485 = vrot.lane.b32.xlu1 %v1321_v6, %s1240_s27 }
 0x338   : > { %v390_v61 = vpop.f32.mrb[0].mxu0 }
 0x339   : > { %v1104_v62 = vpop.f32.mrb[1].mxu0  ;;  %v396_v63 = vsel %vm349_vm2, %v390_v61, -inf }
 0x33a   : > { %397 = vmax.xlane.f32.xlu0 %v396_v63  ;;  %v393_v1 = vpop.f32.mrb[2].mxu0 }
 0x33b   : > { %v1105_v2 = vpop.f32.mrb[3].mxu0 }
 0x351   : > { %v1193_v3 = vpop.permute.xlu1 %1192 }
 0x352   : > { %v1194_v4 = vunpack.i.l.bf16 %v1193_v3  ;;  %v1195_v12 = vunpack.i.h.bf16 %v1193_v3 }
 0x354   : > { %v497_v5 = vsel %vm290_vm0, %v1194_v4, %v490_v36  ;;  %v478_v13 = vsel %vm290_vm0, %v1195_v12, %v471_v38 }
 0x355   : > { %v663_v7 = vpop.permute.xlu1 %662  ;;  %v498_v8 = vmul.f32 %v497_v5, %v1328_v11  ;;  %v479_v15 = vmul.f32 %v478_v13, %v1348_v23 }
 0x356   : > { %v664_v9 = vsel %vm290_vm0, %v663_v7, %v657_v39 }
 0x357   : > { %v665_v10 = vmul.f32 %v664_v9, %v1328_v11  ;;  %500 = vrot.lane.b32.xlu1 %v498_v8, %s1241_s28 }
 0x359   : > { %667 = vrot.lane.b32.xlu0 %v665_v10, %s1242_s29  ;;  %v1198_v16 = vpop.permute.xlu1 %1197 }
 0x35a   : > { %v1199_v17 = vunpack.i.l.bf16 %v1198_v16  ;;  %v1200_v18 = vunpack.i.h.bf16 %v1198_v16 }
 0x35b   : > { %465 = vrot.lane.b32.xlu1 %v1383_v30, %s1227_s25 }
 0x35c   : > { %v645_v19 = vsel %vm290_vm0, %v1199_v17, %v638_v41  ;;  %v831_v22 = vsel %vm290_vm0, %v1200_v18, %v824_v42 }
 0x35d   : > { %v646_v20 = vmul.f32 %v645_v19, %v1348_v23  ;;  %v832_v25 = vmul.f32 %v831_v22, %v1328_v11  ;;  %v811_v31 = vpop.permute.xlu1 %810 }
 0x35e   : > { %v812_v32 = vsel %vm290_vm0, %v811_v31, %v1394_v44 }
 0x35f   : > { %652 = vrot.lane.b32.xlu1 %v1321_v6, %s1243_s30 }
 0x361   : > { %v486_v11 = vpop.permute.xlu1 %485 }
 0x362   : > { %v488_v34 = vmul.f32 %v486_v11, %v1352_v24 }
 0x363   : > { %481 = vrot.lane.b32.xlu1 %v479_v15, %s1228_s7  ;;  %s1247_s7 = smov 52  }
 0x367   : > { %632 = vrot.lane.b32.xlu1 %v1383_v30, %s1244_s6 }
 0x36b   : > { %819 = vrot.lane.b32.xlu1 %v1321_v6, %s1245_s8  ;;  %v813_v6 = vmul.f32 %v812_v32, %v1348_v23 }
 0x36f   : > { %648 = vrot.lane.b32.xlu1 %v646_v20, %s1246_s9 }
 0x373   : > { %834 = vrot.lane.b32.xlu1 %v832_v25, %s1247_s7 }
 0x377   : > { %799 = vrot.lane.b32.xlu1 %v1383_v30, %s1248_s10 }
 0x37b   : > { %815 = vrot.lane.b32.xlu1 %v813_v6, %s1249_s11 }
 0x37f   : > { %411 = vrot.lane.b32.xlu1 %v1065_v33, %s1250_s12 }
 0x3c7   : > { %v398_v35 = vpop.xlane.xlu0 %397 }
 0x3c8   : > { %v399_v36 = vsub.f32 %v390_v61, %v398_v35 }
 0x3c9   : > { %v501_v37 = vpop.permute.xlu1 %500 }
 0x3ca   : > { %v400_v38 = vmul.f32 1.442695, %v399_v36  ;;  %v503_v39 = vadd.f32 %v501_v37, %v488_v34 }
 0x3cb   : > { %v668_v45 = vpop.permute.xlu0 %667 }
 0x3cc   : > { %1202 = vpow2.f32 %v400_v38  ;;  %v505_v40 = vpack.c.bf16 %v503_v39, %v503_v39 }
 0x3cd   : > { %v466_v30 = vpop.permute.xlu1 %465 }
 0x3ce   : > { %510 = vrot.lane.b32.xlu1 %v505_v40, %s1234_s14  ;;  %v468_v41 = vmul.f32 %v466_v30, %v1352_v24 }
 0x3d1   : > { %v653_v23 = vpop.permute.xlu1 %652 }
 0x3d2   : > { %v655_v0 = vmul.f32 %v653_v23, %v1361_v27 }
 0x3d4   : > { %v670_v47 = vadd.f32 %v668_v45, %v655_v0 }
 0x3d5   : > { %v482_v42 = vpop.permute.xlu1 %481 }
 0x3d6   : > { %v1203_v43 = vpop.eup %1202  ;;  %v484_v44 = vadd.f32 %v482_v42, %v468_v41  ;;  %v672_v50 = vpack.c.bf16 %v670_v47, %v670_v47  ;;  %v1072_v41 = vcombine.low %v1356_v26, %v1356_v26 }
 0x3d7   : > { %v402_v46 = vsel %vm349_vm2, %v1203_v43, 0.0 }
 0x3d8   : > { %v504_v48 = vpack.c.bf16 %v484_v44, %v484_v44  ;;  %403 = vadd.xlane.f32.xlu0 %v402_v46  ;;  %v1068_v46 = vcombine.low %v1346_v21, %v1346_v21  ;;  %v1076_v21 = vcombine.low %v1364_v28, %v1364_v28 }
 0x3d9   : > { %v633_v49 = vpop.permute.xlu1 %632 }
 0x3da   : > { %507 = vrot.lane.b32.xlu1 %v504_v48, %s1235_s15  ;;  %v635_v52 = vmul.f32 %v633_v49, %v1361_v27  ;;  %s1474_s15 = scalar_lea.vmem %s1518_s5, %s1058_s20 }
 0x3dd   : > { %v820_v51 = vpop.permute.xlu1 %819 }
 0x3de   : > { %677 = vrot.lane.b32.xlu1 %v672_v50, %s1236_s16  ;;  %v822_v53 = vmul.f32 %v820_v51, %v1371_v29 }
 0x3e1   : > { %v649_v24 = vpop.permute.xlu1 %648 }
 0x3e2   : > { %v651_v54 = vadd.f32 %v649_v24, %v635_v52 }
 0x3e4   : > { %v671_v55 = vpack.c.bf16 %v651_v54, %v651_v54 }
 0x3e5   : > { %v835_v56 = vpop.permute.xlu1 %834 }
 0x3e6   : > { %v837_v57 = vadd.f32 %v835_v56, %v822_v53  ;;  %674 = vrot.lane.b32.xlu1 %v671_v55, %s1237_s17 }
 0x3e8   : > { %v839_v58 = vpack.c.bf16 %v837_v57, %v837_v57 }
 0x3e9   : > { %v800_v59 = vpop.permute.xlu1 %799 }
 0x3ea   : > { %v802_v60 = vmul.f32 %v800_v59, %v1371_v29  ;;  %844 = vrot.lane.b32.xlu1 %v839_v58, %s1238_s21 }
 0x3ed   : > { %v816_v61 = vpop.permute.xlu1 %815 }
 0x3ee   : > { %v818_v62 = vadd.f32 %v816_v61, %v802_v60 }
 0x3f0   : > { %v838_v27 = vpack.c.bf16 %v818_v62, %v818_v62 }
 0x3f1   : > { %v412_v63 = vpop.permute.xlu1 %411 }
 0x3f2   : > { %841 = vrot.lane.b32.xlu1 %v838_v27, %s1239_s22  ;;  %v418_v1 = vsel %vm416_vm3, %v412_v63, 0 }
 0x3f3   : > { %1107 = vmatpush3.bf16.msra.mxu1 %v418_v1 }
 0x3f4   : > { %1112 = vmatprep.subr.bf16.mxu1 %v1231_v14 }
 0x440   : > { %v511_v3 = vpop.permute.xlu1 %510 }
 0x441   : > { %v516_v8 = vsel %vm349_vm2, %v511_v3, 0 }
 0x44c   : > { %v508_v29 = vpop.permute.xlu1 %507 }
 0x450   : > { %v678_v9 = vpop.permute.xlu1 %677 }
 0x451   : > { %v683_v12 = vsel %vm349_vm2, %v678_v9, 0 }
 0x458   : > { %v675_v10 = vpop.permute.xlu1 %674 }
 0x45c   : > { %v845_v13 = vpop.permute.xlu1 %844 }
 0x45d   : > { %v850_v15 = vsel %vm349_vm2, %v845_v13, 0 }
 0x464   : > { %v842_v16 = vpop.permute.xlu1 %841 }
 0x465   : > { %v404_v2 = vpop.xlane.xlu0 %403 }
 0x466   : > { %1204 = vrcp.f32 %v404_v2 }
 0x470   : > { %v1205_v4 = vpop.eup %1204 }
 0x471   : > { %v406_v5 = vmul.f32 %v1205_v4, %v1203_v43 }
 0x473   : > { %v407_v7 = vpack.c.bf16 %v406_v5, %v406_v5 }
 0x475   : > { %1109 = vmatmul.mubr.msk.bf16.vlgmr.msra.gmra.mrb[0].mxu1 %vm349_vm2, %v407_v7 }
 0x476   : > { %1113 = vmatpush3.bf16.xpose.msra.mxu1 %v516_v8  ;;  %1114 = vmatprep.mubr.msk.bf16.mxu1 %vm1232_vm1, %v1231_v14 }
 0x477   : > { %1124 = vmatprep.subr.bf16.mxu1 %v1231_v14 }
 0x47d   : > { %1115 = vmatmul.mubr.msk.bf16.vlgmr.msra.gmra.mrb[4].mxu1 %vm349_vm2, %v508_v29 }
 0x47e   : > { %1125 = vmatpush3.bf16.xpose.msra.mxu1 %v683_v12  ;;  %1126 = vmatprep.mubr.msk.bf16.mxu1 %vm1232_vm1, %v1231_v14 }
 0x47f   : > { %1136 = vmatprep.subr.bf16.mxu1 %v1231_v14 }
 0x485   : > { %1127 = vmatmul.mubr.msk.bf16.vlgmr.msra.gmra.mrb[8].mxu1 %vm349_vm2, %v675_v10 }
 0x486   : > { %1137 = vmatpush3.bf16.xpose.msra.mxu1 %v850_v15  ;;  %1138 = vmatprep.mubr.msk.bf16.mxu1 %vm1232_vm1, %v1231_v14 }
 0x48d   : > { %1139 = vmatmul.mubr.msk.bf16.vlgmr.msra.gmra.mrb[12].mxu1 %vm349_vm2, %v842_v16 }
 0x548   : > { %v454_v17 = vpop.f32.mrb[0].mxu1 }
 0x549   : > { %v460_v18 = vpack.c.bf16 %v454_v17, %v454_v17  ;;  %v1110_v19 = vpop.f32.mrb[1].mxu1 }
 0x54a   : > { %v457_v20 = vpop.f32.mrb[2].mxu1 }
 0x54b   : > { %462 = vst.msk [vmem:[%s1474_s15] sm:$0xf] %vm461_vm4, %v460_v18  ;;  %v1111_v22 = vpop.f32.mrb[3].mxu1 }
 0x550   : > { %v552_v25 = vpop.f32.mrb[4].mxu1 }
 0x551   : > { %v1116_v31 = vpop.f32.mrb[5].mxu1  ;;  %v558_v32 = vsel %vm349_vm2, %v552_v25, -inf }
 0x552   : > { %559 = vmax.xlane.f32.xlu0 %v558_v32  ;;  %v555_v6 = vpop.f32.mrb[6].mxu1 }
 0x553   : > { %v1117_v33 = vpop.f32.mrb[7].mxu1 }
 0x558   : > { %v719_v11 = vpop.f32.mrb[8].mxu1 }
 0x559   : > { %v1128_v34 = vpop.f32.mrb[9].mxu1  ;;  %v725_v35 = vsel %vm349_vm2, %v719_v11, -inf }
 0x55a   : > { %726 = vmax.xlane.f32.xlu1 %v725_v35  ;;  %v722_v36 = vpop.f32.mrb[10].mxu1 }
 0x55b   : > { %v1129_v37 = vpop.f32.mrb[11].mxu1 }
 0x560   : > { %v886_v38 = vpop.f32.mrb[12].mxu1 }
 0x561   : > { %v1140_v39 = vpop.f32.mrb[13].mxu1  ;;  %v892_v40 = vsel %vm349_vm2, %v886_v38, -inf }
 0x562   : > { %893 = vmax.xlane.f32.xlu0 %v892_v40  ;;  %v889_v30 = vpop.f32.mrb[14].mxu1 }
 0x563   : > { %v1141_v23 = vpop.f32.mrb[15].mxu1 }
 0x56b   : > { %740 = vrot.lane.b32.xlu1 %v1072_v41, %s1243_s30 }
 0x5df   : > { %v560_v0 = vpop.xlane.xlu0 %559 }
 0x5e0   : > { %v561_v42 = vsub.f32 %v552_v25, %v560_v0 }
 0x5e2   : > { %v562_v43 = vmul.f32 1.442695, %v561_v42 }
 0x5e4   : > { %1206 = vpow2.f32 %v562_v43 }
 0x5e7   : > { %v727_v47 = vpop.xlane.xlu1 %726 }
 0x5e8   : > { %v728_v48 = vsub.f32 %v719_v11, %v727_v47 }
 0x5ea   : > { %v729_v50 = vmul.f32 1.442695, %v728_v48 }
 0x5eb   : > { %v741_v59 = vpop.permute.xlu1 %740 }
 0x5ec   : > { %1208 = vpow2.f32 %v729_v50  ;;  %v746_v62 = vsel %vm416_vm3, %v741_v59, 0 }
 0x5ee   : > { %v1207_v44 = vpop.eup %1206 }
 0x5ef   : > { %v564_v45 = vsel %vm349_vm2, %v1207_v44, 0.0  ;;  %v894_v49 = vpop.xlane.xlu0 %893 }
 0x5f0   : > { %565 = vadd.xlane.f32.xlu0 %v564_v45  ;;  %v895_v26 = vsub.f32 %v886_v38, %v894_v49 }
 0x5f2   : > { %v896_v51 = vmul.f32 1.442695, %v895_v26 }
 0x5f4   : > { %1210 = vpow2.f32 %v896_v51 }
 0x5f6   : > { %v1209_v52 = vpop.eup %1208 }
 0x5f7   : > { %v731_v24 = vsel %vm349_vm2, %v1209_v52, 0.0 }
 0x5fe   : > { %v1211_v53 = vpop.eup %1210 }
 0x5ff   : > { %v898_v54 = vsel %vm349_vm2, %v1211_v53, 0.0 }
 0x606   : > { %573 = vrot.lane.b32.xlu0 %v1068_v46, %s1245_s8 }
 0x625   : > { %732 = vadd.xlane.f32.xlu0 %v731_v24 }
 0x629   : > { %899 = vadd.xlane.f32.xlu0 %v898_v54 }
 0x63f   : > { %907 = vrot.lane.b32.xlu0 %v1076_v21, %s1240_s27 }
 0x67d   : > { %v566_v55 = vpop.xlane.xlu0 %565 }
 0x67e   : > { %1212 = vrcp.f32 %v566_v55 }
 0x681   : > { %v574_v56 = vpop.permute.xlu0 %573 }
 0x682   : > { %v579_v57 = vsel %vm416_vm3, %v574_v56, 0 }
 0x683   : > { %1119 = vmatpush3.bf16.msra.mxu0 %v579_v57 }
 0x684   : > { %1130 = vmatprep.subr.bf16.mxu0 %v1231_v14 }
 0x688   : > { %v1213_v58 = vpop.eup %1212 }
 0x689   : > { %v568_v60 = vmul.f32 %v1213_v58, %v1207_v44 }
 0x68b   : > { %v569_v61 = vpack.c.bf16 %v568_v60, %v568_v60 }
 0x68d   : > { %1121 = vmatmul.mubr.msk.bf16.vlgmr.msra.gmra.mrb[4].mxu0 %vm349_vm2, %v569_v61 }
 0x68e   : > { %1131 = vmatpush3.bf16.msra.mxu0 %v746_v62  ;;  %1132 = vmatprep.mubr.msk.bf16.mxu0 %vm1232_vm1, %v1231_v14 }
 0x68f   : > { %1142 = vmatprep.subr.bf16.mxu0 %v1231_v14 }
 0x6b2   : > { %v733_v28 = vpop.xlane.xlu0 %732 }
 0x6b3   : > { %1214 = vrcp.f32 %v733_v28 }
 0x6b6   : > { %v900_v27 = vpop.xlane.xlu0 %899 }
 0x6b7   : > { %1216 = vrcp.f32 %v900_v27 }
 0x6ba   : > { %v908_v1 = vpop.permute.xlu0 %907 }
 0x6bb   : > { %v913_v3 = vsel %vm416_vm3, %v908_v1, 0 }
 0x6bd   : > { %v1215_v63 = vpop.eup %1214 }
 0x6be   : > { %v735_v2 = vmul.f32 %v1215_v63, %v1209_v52 }
 0x6c0   : > { %v736_v4 = vpack.c.bf16 %v735_v2, %v735_v2 }
 0x6c1   : > { %v1217_v5 = vpop.eup %1216 }
 0x6c2   : > { %1133 = vmatmul.mubr.msk.bf16.vlgmr.msra.gmra.mrb[8].mxu0 %vm349_vm2, %v736_v4  ;;  %v902_v29 = vmul.f32 %v1217_v5, %v1211_v53 }
 0x6c3   : > { %1143 = vmatpush3.bf16.msra.mxu0 %v913_v3  ;;  %1144 = vmatprep.mubr.msk.bf16.mxu0 %vm1232_vm1, %v1231_v14 }
 0x6c4   : > { %v903_v7 = vpack.c.bf16 %v902_v29, %v902_v29 }
 0x6ca   : > { %1145 = vmatmul.mubr.msk.bf16.vlgmr.msra.gmra.mrb[12].mxu0 %vm349_vm2, %v903_v7 }
 0x760   : > { %v615_v8 = vpop.f32.mrb[4].mxu0 }
 0x761   : > { %v1081_v9 = vpack.c.bf16 %v615_v8, %v615_v8  ;;  %v1122_v10 = vpop.f32.mrb[5].mxu0 }
 0x762   : > { %v618_v12 = vpop.f32.mrb[6].mxu0 }
 0x763   : > { %625 = vrot.lane.b32.xlu0 %v1081_v9, %s1227_s25  ;;  %v1123_v13 = vpop.f32.mrb[7].mxu0 }
 0x795   : > { %v782_v15 = vpop.f32.mrb[8].mxu0 }
 0x796   : > { %v1082_v16 = vpack.c.bf16 %v782_v15, %v782_v15  ;;  %v1134_v17 = vpop.f32.mrb[9].mxu0 }
 0x797   : > { %v785_v18 = vpop.f32.mrb[10].mxu0 }
 0x798   : > { %792 = vrot.lane.b32.xlu0 %v1082_v16, %s1244_s6  ;;  %v1135_v14 = vpop.f32.mrb[11].mxu0 }
 0x79d   : > { %v949_v19 = vpop.f32.mrb[12].mxu0 }
 0x79e   : > { %v1083_v20 = vpack.c.bf16 %v949_v19, %v949_v19  ;;  %v1146_v22 = vpop.f32.mrb[13].mxu0 }
 0x79f   : > { %v952_v25 = vpop.f32.mrb[14].mxu0 }
 0x7a0   : > { %959 = vrot.lane.b32.xlu1 %v1083_v20, %s1248_s10  ;;  %v1147_v31 = vpop.f32.mrb[15].mxu0 }
 0x7d5   : > { %v626_v32 = vpop.permute.xlu0 %625 }
 0x7d6   : > { %629 = vst.msk [vmem:[%s1474_s15] sm:$0xf] %vm628_vm5, %v626_v32 }
 0x80a   : > { %v793_v6 = vpop.permute.xlu0 %792 }
 0x80b   : > { %796 = vst.msk [vmem:[%s1474_s15] sm:$0xf] %vm795_vm6, %v793_v6 }
 0x812   : > { %v960_v33 = vpop.permute.xlu1 %959 }
 0x813   : > { %963 = vst.msk [vmem:[%s1474_s15] sm:$0xf] %vm962_vm7, %v960_v33 }
 0x814 PF: > { %s15_s18 = sadd.s32 1, %s1224_s18  }
 0x815   : > { %p12_p4 = scmp.ge.s32.totalorder %s15_s18, 4  }
 0x817   :  { %14 = sbr.rel (!%p12_p4) target bundleno = 1 (0x1), region = 82 }

</bundles_post_ra>
